<compile_context>
chip_gen: v7x
topology: tpu7x:2x2x1
jax: 0.10.0
libtpu: 0.0.40
codegen_flags: <defaults>
</compile_context>

<pallas_src>
import jax
import jax.numpy as jnp
from jax.experimental import pallas as pl
from jax.experimental.pallas import tpu as pltpu


def _round_up(x, m):
    return (x + m - 1) // m * m


def _mlp_kernel(x_ref,
                w1_ref, b1_ref,
                w2_ref, b2_ref,
                w3_ref, b3_ref,
                w4_ref, b4_ref,
                o_ref):
    """Fused 4-layer MLP: (Linear+ReLU) x3 -> Linear. Dots in bf16, acc f32."""
    x = x_ref[...]                                                    # (TB, Din) bf16

    h = jnp.dot(x, w1_ref[...], preferred_element_type=jnp.float32)
    h = jnp.maximum(h + b1_ref[...], 0.0)                             # f32 bias/ReLU

    h = jnp.dot(h.astype(w2_ref.dtype), w2_ref[...],
                preferred_element_type=jnp.float32)
    h = jnp.maximum(h + b2_ref[...], 0.0)

    h = jnp.dot(h.astype(w3_ref.dtype), w3_ref[...],
                preferred_element_type=jnp.float32)
    h = jnp.maximum(h + b3_ref[...], 0.0)

    out = jnp.dot(h.astype(w4_ref.dtype), w4_ref[...],
                  preferred_element_type=jnp.float32) + b4_ref[...]
    o_ref[...] = out.astype(o_ref.dtype)


def discriminator_forward(x_nchw, params, *, compute_dtype=jnp.bfloat16,
                          tile_b=256):
    """x_nchw: (B, C, H, W) float32. Returns (B, output_disc) float32."""
    B = x_nchw.shape[0]
    d_in = x_nchw.shape[1] * x_nchw.shape[2] * x_nchw.shape[3]
    x = x_nchw.reshape(B, d_in)  # same as PyTorch .view(B, C*H*W)

    (w1, b1), (w2, b2), (w3, b3), (w4, b4) = params
    ndf = w1.shape[1]
    out_dim = w4.shape[1]

    # Lane-dense padded dims (zeros, so math is unchanged).
    d_in_p = _round_up(d_in, 128)
    ndf_p = _round_up(ndf, 128)
    out_p = _round_up(out_dim, 128)

    # Batch tile: multiple of 8 (f32 sublane), capped at tile_b.
    tb = tile_b if B >= tile_b else max(8, _round_up(B, 8))
    b_p = _round_up(B, tb)
    grid = (b_p // tb,)

    def pad_w(w, r, c):
        return (jnp.zeros((r, c), compute_dtype)
                .at[:w.shape[0], :w.shape[1]].set(w.astype(compute_dtype)))

    def pad_b(b, c):
        return (jnp.zeros((1, c), jnp.float32)
                .at[0, :b.shape[0]].set(b.astype(jnp.float32)))

    x_p = (jnp.zeros((b_p, d_in_p), compute_dtype)
           .at[:B, :d_in].set(x.astype(compute_dtype)))
    w1p, b1p = pad_w(w1, d_in_p, ndf_p), pad_b(b1, ndf_p)
    w2p, b2p = pad_w(w2, ndf_p, ndf_p), pad_b(b2, ndf_p)
    w3p, b3p = pad_w(w3, ndf_p, ndf_p), pad_b(b3, ndf_p)
    w4p, b4p = pad_w(w4, ndf_p, out_p), pad_b(b4, out_p)

    def const(shape):
        # Resident operand: same block every grid step -> DMA'd once.
        return pl.BlockSpec(shape, lambda i: (0, 0))

    flops = 2 * b_p * (d_in_p * ndf_p + 2 * ndf_p * ndf_p + ndf_p * out_p)
    weight_bytes = sum(int(a.size) * a.dtype.itemsize
                       for a in (w1p, b1p, w2p, b2p, w3p, b3p, w4p, b4p))
    bytes_accessed = (int(x_p.size) * x_p.dtype.itemsize
                      + weight_bytes
                      + b_p * out_p * 4)

    out = pl.pallas_call(
        _mlp_kernel,
        out_shape=jax.ShapeDtypeStruct((b_p, out_p), jnp.float32),
        grid=grid,
        in_specs=[
            pl.BlockSpec((tb, d_in_p), lambda i: (i, 0)),   # x: tiled over batch
            const((d_in_p, ndf_p)), const((1, ndf_p)),      # w1, b1 (resident)
            const((ndf_p, ndf_p)), const((1, ndf_p)),       # w2, b2
            const((ndf_p, ndf_p)), const((1, ndf_p)),       # w3, b3
            const((ndf_p, out_p)), const((1, out_p)),       # w4, b4
        ],
        out_specs=pl.BlockSpec((tb, out_p), lambda i: (i, 0)),
        compiler_params=pltpu.CompilerParams(
            dimension_semantics=("parallel",)),
        cost_estimate=pl.CostEstimate(
            flops=flops, transcendentals=0, bytes_accessed=bytes_accessed),
    )(x_p, w1p, b1p, w2p, b2p, w3p, b3p, w4p, b4p)

    return out[:B, :out_dim]


def init_params(key, n_channel, image_size, ndf, output_disc):
    """PyTorch-style uniform(+/- 1/sqrt(fan_in)) init; W stored (in, out)."""
    d_in = n_channel * image_size * image_size
    dims = [(d_in, ndf), (ndf, ndf), (ndf, ndf), (ndf, output_disc)]
    params = []
    for (fin, fout) in dims:
        key, kw, kb = jax.random.split(key, 3)
        bound = 1.0 / jnp.sqrt(jnp.float32(fin))
        w = jax.random.uniform(kw, (fin, fout), jnp.float32, -bound, bound)
        b = jax.random.uniform(kb, (fout,), jnp.float32, -bound, bound)
        params.append((w, b))
    return params


def _reference_forward(x_nchw, params):
    B = x_nchw.shape[0]
    x = x_nchw.reshape(B, -1)
    (w1, b1), (w2, b2), (w3, b3), (w4, b4) = params
    h = jax.nn.relu(x @ w1 + b1)
    h = jax.nn.relu(h @ w2 + b2)
    h = jax.nn.relu(h @ w3 + b3)
    return h @ w4 + b4


if __name__ == "__main__":
    # Module hyperparameters (small, consistent with the forward pass).
    n_channel = 4
    image_size = 16
    ndf = 32
    output_disc = 1

    key = jax.random.PRNGKey(0)
    key, kx = jax.random.split(key)

    x = jax.random.normal(kx, (2, n_channel, image_size, image_size), jnp.float32)
    params = init_params(key, n_channel, image_size, ndf, output_disc)

    out = discriminator_forward(x, params)
    out = jax.block_until_ready(out)

    ref = _reference_forward(x, params)
    assert out.shape == (2, output_disc)
    # bf16 matmul inputs with f32 accumulation -> looser tolerance than pure f32.
    assert jnp.allclose(out, ref, atol=1e-2, rtol=1e-2)

    print("KERNEL_OK")
</pallas_src>

<mosaic_0001>
module attributes {stable_mosaic.version = 11 : i64} {
  func.func @_mlp_kernel(%arg0: i32, %arg1: memref<8x1024xbf16, #tpu.memory_space<vmem>>, %arg2: memref<1024x128xbf16, #tpu.memory_space<vmem>>, %arg3: memref<1x128xf32, #tpu.memory_space<vmem>>, %arg4: memref<128x128xbf16, #tpu.memory_space<vmem>>, %arg5: memref<1x128xf32, #tpu.memory_space<vmem>>, %arg6: memref<128x128xbf16, #tpu.memory_space<vmem>>, %arg7: memref<1x128xf32, #tpu.memory_space<vmem>>, %arg8: memref<128x128xbf16, #tpu.memory_space<vmem>>, %arg9: memref<1x128xf32, #tpu.memory_space<vmem>>, %arg10: memref<8x128xf32, #tpu.memory_space<vmem>>) attributes {dimension_semantics = [#tpu.dimension_semantics<parallel>], iteration_bounds = array<i64: 1>, scalar_prefetch = 0 : i64, scratch_operands = 0 : i64, tpu.core_type = #tpu.core_type<tc>, window_params = [{transform_indices = @transform_0, window_bounds = array<i64: 8, 1024>}, {pipeline_mode = #tpu.pipeline_mode<synchronous>, transform_indices = @transform_1, window_bounds = array<i64: 1024, 128>}, {pipeline_mode = #tpu.pipeline_mode<synchronous>, transform_indices = @transform_2, window_bounds = array<i64: 1, 128>}, {pipeline_mode = #tpu.pipeline_mode<synchronous>, transform_indices = @transform_3, window_bounds = array<i64: 128, 128>}, {pipeline_mode = #tpu.pipeline_mode<synchronous>, transform_indices = @transform_4, window_bounds = array<i64: 1, 128>}, {pipeline_mode = #tpu.pipeline_mode<synchronous>, transform_indices = @transform_5, window_bounds = array<i64: 128, 128>}, {pipeline_mode = #tpu.pipeline_mode<synchronous>, transform_indices = @transform_6, window_bounds = array<i64: 1, 128>}, {pipeline_mode = #tpu.pipeline_mode<synchronous>, transform_indices = @transform_7, window_bounds = array<i64: 128, 128>}, {pipeline_mode = #tpu.pipeline_mode<synchronous>, transform_indices = @transform_8, window_bounds = array<i64: 1, 128>}, {transform_indices = @transform_9, window_bounds = array<i64: 8, 128>}]} {
    %c0 = arith.constant 0 : index
    %c0_0 = arith.constant 0 : index
    %0 = vector.load %arg1[%c0, %c0_0] : memref<8x1024xbf16, #tpu.memory_space<vmem>>, vector<8x1024xbf16>
    %c0_1 = arith.constant 0 : index
    %c0_2 = arith.constant 0 : index
    %1 = vector.load %arg2[%c0_1, %c0_2] : memref<1024x128xbf16, #tpu.memory_space<vmem>>, vector<1024x128xbf16>
    %cst = arith.constant dense<0.000000e+00> : vector<8x128xf32>
    %2 = tpu.matmul %0, %1, %cst {dimension_numbers = #tpu.dot_dimension_numbers<[1], [0], [0], [1], [0, 0, 1, 1], [], []>} : vector<8x1024xbf16>, vector<1024x128xbf16>, vector<8x128xf32> -> vector<8x128xf32>
    %c0_3 = arith.constant 0 : index
    %c0_4 = arith.constant 0 : index
    %3 = vector.load %arg3[%c0_3, %c0_4] : memref<1x128xf32, #tpu.memory_space<vmem>>, vector<1x128xf32>
    %4 = vector.broadcast %3 : vector<1x128xf32> to vector<8x128xf32>
    %5 = arith.addf %2, %4 : vector<8x128xf32>
    %cst_5 = arith.constant 0.000000e+00 : f32
    %6 = vector.broadcast %cst_5 : f32 to vector<8x128xf32>
    %7 = arith.maximumf %5, %6 : vector<8x128xf32>
    %8 = arith.truncf %7 : vector<8x128xf32> to vector<8x128xbf16>
    %c0_6 = arith.constant 0 : index
    %c0_7 = arith.constant 0 : index
    %9 = vector.load %arg4[%c0_6, %c0_7] : memref<128x128xbf16, #tpu.memory_space<vmem>>, vector<128x128xbf16>
    %cst_8 = arith.constant dense<0.000000e+00> : vector<8x128xf32>
    %10 = tpu.matmul %8, %9, %cst_8 {dimension_numbers = #tpu.dot_dimension_numbers<[1], [0], [0], [1], [0, 0, 1, 1], [], []>} : vector<8x128xbf16>, vector<128x128xbf16>, vector<8x128xf32> -> vector<8x128xf32>
    %c0_9 = arith.constant 0 : index
    %c0_10 = arith.constant 0 : index
    %11 = vector.load %arg5[%c0_9, %c0_10] : memref<1x128xf32, #tpu.memory_space<vmem>>, vector<1x128xf32>
    %12 = vector.broadcast %11 : vector<1x128xf32> to vector<8x128xf32>
    %13 = arith.addf %10, %12 : vector<8x128xf32>
    %cst_11 = arith.constant 0.000000e+00 : f32
    %14 = vector.broadcast %cst_11 : f32 to vector<8x128xf32>
    %15 = arith.maximumf %13, %14 : vector<8x128xf32>
    %16 = arith.truncf %15 : vector<8x128xf32> to vector<8x128xbf16>
    %c0_12 = arith.constant 0 : index
    %c0_13 = arith.constant 0 : index
    %17 = vector.load %arg6[%c0_12, %c0_13] : memref<128x128xbf16, #tpu.memory_space<vmem>>, vector<128x128xbf16>
    %cst_14 = arith.constant dense<0.000000e+00> : vector<8x128xf32>
    %18 = tpu.matmul %16, %17, %cst_14 {dimension_numbers = #tpu.dot_dimension_numbers<[1], [0], [0], [1], [0, 0, 1, 1], [], []>} : vector<8x128xbf16>, vector<128x128xbf16>, vector<8x128xf32> -> vector<8x128xf32>
    %c0_15 = arith.constant 0 : index
    %c0_16 = arith.constant 0 : index
    %19 = vector.load %arg7[%c0_15, %c0_16] : memref<1x128xf32, #tpu.memory_space<vmem>>, vector<1x128xf32>
    %20 = vector.broadcast %19 : vector<1x128xf32> to vector<8x128xf32>
    %21 = arith.addf %18, %20 : vector<8x128xf32>
    %cst_17 = arith.constant 0.000000e+00 : f32
    %22 = vector.broadcast %cst_17 : f32 to vector<8x128xf32>
    %23 = arith.maximumf %21, %22 : vector<8x128xf32>
    %24 = arith.truncf %23 : vector<8x128xf32> to vector<8x128xbf16>
    %c0_18 = arith.constant 0 : index
    %c0_19 = arith.constant 0 : index
    %25 = vector.load %arg8[%c0_18, %c0_19] : memref<128x128xbf16, #tpu.memory_space<vmem>>, vector<128x128xbf16>
    %cst_20 = arith.constant dense<0.000000e+00> : vector<8x128xf32>
    %26 = tpu.matmul %24, %25, %cst_20 {dimension_numbers = #tpu.dot_dimension_numbers<[1], [0], [0], [1], [0, 0, 1, 1], [], []>} : vector<8x128xbf16>, vector<128x128xbf16>, vector<8x128xf32> -> vector<8x128xf32>
    %c0_21 = arith.constant 0 : index
    %c0_22 = arith.constant 0 : index
    %27 = vector.load %arg9[%c0_21, %c0_22] : memref<1x128xf32, #tpu.memory_space<vmem>>, vector<1x128xf32>
    %28 = vector.broadcast %27 : vector<1x128xf32> to vector<8x128xf32>
    %29 = arith.addf %26, %28 : vector<8x128xf32>
    %c0_23 = arith.constant 0 : index
    %c0_24 = arith.constant 0 : index
    %30 = vector.load %arg10[%c0_23, %c0_24] : memref<8x128xf32, #tpu.memory_space<vmem>>, vector<8x128xf32>
    tpu.vector_store %arg10[%c0_23, %c0_24], %29 {strides = array<i32>} : memref<8x128xf32, #tpu.memory_space<vmem>>, vector<8x128xf32>,
    return
  }
  func.func @transform_0(%arg0: i32) -> (i32, i32) {
    %c0_i32 = arith.constant 0 : i32
    %c0_i32_0 = arith.constant 0 : i32
    return %arg0, %c0_i32 : i32, i32
  }
  func.func @transform_1(%arg0: i32) -> (i32, i32) {
    %c0_i32 = arith.constant 0 : i32
    %c0_i32_0 = arith.constant 0 : i32
    %c0_i32_1 = arith.constant 0 : i32
    return %c0_i32, %c0_i32_0 : i32, i32
  }
  func.func @transform_2(%arg0: i32) -> (i32, i32) {
    %c0_i32 = arith.constant 0 : i32
    %c0_i32_0 = arith.constant 0 : i32
    %c0_i32_1 = arith.constant 0 : i32
    return %c0_i32, %c0_i32_0 : i32, i32
  }
  func.func @transform_3(%arg0: i32) -> (i32, i32) {
    %c0_i32 = arith.constant 0 : i32
    %c0_i32_0 = arith.constant 0 : i32
    %c0_i32_1 = arith.constant 0 : i32
    return %c0_i32, %c0_i32_0 : i32, i32
  }
  func.func @transform_4(%arg0: i32) -> (i32, i32) {
    %c0_i32 = arith.constant 0 : i32
    %c0_i32_0 = arith.constant 0 : i32
    %c0_i32_1 = arith.constant 0 : i32
    return %c0_i32, %c0_i32_0 : i32, i32
  }
  func.func @transform_5(%arg0: i32) -> (i32, i32) {
    %c0_i32 = arith.constant 0 : i32
    %c0_i32_0 = arith.constant 0 : i32
    %c0_i32_1 = arith.constant 0 : i32
    return %c0_i32, %c0_i32_0 : i32, i32
  }
  func.func @transform_6(%arg0: i32) -> (i32, i32) {
    %c0_i32 = arith.constant 0 : i32
    %c0_i32_0 = arith.constant 0 : i32
    %c0_i32_1 = arith.constant 0 : i32
    return %c0_i32, %c0_i32_0 : i32, i32
  }
  func.func @transform_7(%arg0: i32) -> (i32, i32) {
    %c0_i32 = arith.constant 0 : i32
    %c0_i32_0 = arith.constant 0 : i32
    %c0_i32_1 = arith.constant 0 : i32
    return %c0_i32, %c0_i32_0 : i32, i32
  }
  func.func @transform_8(%arg0: i32) -> (i32, i32) {
    %c0_i32 = arith.constant 0 : i32
    %c0_i32_0 = arith.constant 0 : i32
    %c0_i32_1 = arith.constant 0 : i32
    return %c0_i32, %c0_i32_0 : i32, i32
  }
  func.func @transform_9(%arg0: i32) -> (i32, i32) {
    %c0_i32 = arith.constant 0 : i32
    %c0_i32_0 = arith.constant 0 : i32
    return %arg0, %c0_i32 : i32, i32
  }
}

</mosaic_0001>

<bundles_post_ra>
// kernel: tpu_custom_call.1
= control target key start
LH: loop header
LB: loop body
LE: loop exit
PB: predicated region body
PF: predicated region fallthrough
CT: control target
= control target key end

     0   :  { %14 = vsyncpa [#allocation3], 0  ;;  %s1875_s0 = inlined_call_operand.hbm [shape: bf16[8,1024], index: 0, kind: input, shape index: {}]   ;;  %s1876_s1 = inlined_call_operand.hbm [shape: bf16[1024,128], index: 1, kind: input, shape index: {}]   ;;  %s1877_s2 = inlined_call_operand.vmem [shape: f32[1,128], index: 2, kind: input, shape index: {}]   ;;  %s1878_s3 = inlined_call_operand.hbm [shape: bf16[128,128], index: 3, kind: input, shape index: {}]   ;;  %s1879_s4 = inlined_call_operand.vmem [shape: f32[1,128], index: 4, kind: input, shape index: {}]   ;;  %s1880_s5 = inlined_call_operand.hbm [shape: bf16[128,128], index: 5, kind: input, shape index: {}]   ;;  %s1881_s6 = inlined_call_operand.vmem [shape: f32[1,128], index: 6, kind: input, shape index: {}]   ;;  %s1882_s7 = inlined_call_operand.hbm [shape: bf16[128,128], index: 7, kind: input, shape index: {}]   ;;  %s1883_s8 = inlined_call_operand.vmem [shape: f32[1,128], index: 8, kind: input, shape index: {}]   ;;  %s1884_s9 = inlined_call_operand.hbm [shape: f32[8,128], index: 9, kind: output, shape index: {}]  }
   0x1   :  { %15 = vsyncpa [#allocation6], 0 }
   0x2   :  { %16 = vsyncpa [#allocation9], 0 }
   0x3   :  { %17 = vsyncpa [#allocation4], 0  ;;  %s1689_s30 = smov [#allocation5]   ;;  %s1549_s13 = scalar_lea.hbm %s1876_s1, 8192 }
   0x4   :  { %s33_s10 = sshll.u32 %s1689_s30, 4  ;;  %p1550_p0 = scmp.ne.s32.totalorder %s1876_s1, %s1549_s13  ;;  %s34_s10 = int_to_ptr.vmem [resolvable:$true] %s33_s10 }
   0x5   :  { %p1553_p1 = scmp.lt.u32.totalorder %s1549_s13, %s1876_s1 }
   0x7   :  { %p1555_p2 = pnand %p1553_p1, %p1550_p0 }
   0x9   :  { %1558 = shalt.err (!%p1555_p2)
}
   0xa   :  { %s1559_s18 = scalar_lea.vmem %s34_s10, 8192  ;;  %p1564_p4 = scmp.lt.s32.totalorder %s34_s10, %s34_s10 }
   0xb   :  { %p1560_p3 = scmp.ne.s32.totalorder %s34_s10, %s1559_s18  ;;  %p1565_p5 = scmp.lt.s32.totalorder %s1559_s18, %s1559_s18 }
   0xd   :  { %p1566_p6 = por %p1565_p5, %p1564_p4 }
   0xf   :  { %p1567_p7 = pnand %p1566_p6, %p1560_p3 }
  0x11   :  { %1570 = shalt.err (!%p1567_p7)
}
  0x12   :  { %s1690_s19 = smov 64   ;;  %s1691_s20 = smov 4  }
  0x13   :  { %39 = dma.hbm_to_vmem [thread:$0]  %s1876_s1, 8192, %s34_s10, [#allocation6], %s1690_s19, %s1690_s19, %s1691_s20  }
  0x14   :  { %s1692_s23 = smov [#allocation8]   ;;  %s1693_s25 = smov [#allocation2]  }
  0x15   :  { %s61_s24 = sshll.u32 %s1692_s23, 4  ;;  %s24_s26 = sshll.u32 %s1693_s25, 4  ;;  %s62_s24 = int_to_ptr.vmem [resolvable:$true] %s61_s24  ;;  %s25_s26 = int_to_ptr.vmem [resolvable:$true] %s24_s26 }
  0x16   :  { %s1571_s29 = scalar_lea.hbm %s1880_s5, 1024 }
  0x17   :  { %p1572_p8 = scmp.ne.s32.totalorder %s1880_s5, %s1571_s29  ;;  %p1575_p9 = scmp.lt.u32.totalorder %s1571_s29, %s1880_s5 }
  0x19   :  { %p1577_p10 = pnand %p1575_p9, %p1572_p8 }
  0x1b   :  { %1580 = shalt.err (!%p1577_p10)
}
  0x1c   :  { %s1581_s1 = scalar_lea.vmem %s62_s24, 1024  ;;  %p1586_p12 = scmp.lt.s32.totalorder %s62_s24, %s62_s24 }
  0x1d   :  { %p1582_p11 = scmp.ne.s32.totalorder %s62_s24, %s1581_s1  ;;  %p1587_p13 = scmp.lt.s32.totalorder %s1581_s1, %s1581_s1 }
  0x1f   :  { %p1588_p0 = por %p1587_p13, %p1586_p12 }
  0x21   :  { %p1589_p1 = pnand %p1588_p0, %p1582_p11 }
  0x23   :  { %1592 = shalt.err (!%p1589_p1)
}
  0x24   :  { %67 = dma.hbm_to_vmem [thread:$0]  %s1880_s5, 1024, %s62_s24, [#allocation9], %s1690_s19, %s1690_s19, %s1691_s20  }
  0x25   :  { %s1593_s17 = scalar_lea.hbm %s1875_s0, 512 }
  0x26   :  { %p1594_p2 = scmp.ne.s32.totalorder %s1875_s0, %s1593_s17  ;;  %p1597_p3 = scmp.lt.u32.totalorder %s1593_s17, %s1875_s0 }
  0x28   :  { %p1599_p4 = pnand %p1597_p3, %p1594_p2 }
  0x2a   :  { %1602 = shalt.err (!%p1599_p4)
}
  0x2b   :  { %s1603_s25 = scalar_lea.vmem %s25_s26, 512  ;;  %p1608_p6 = scmp.lt.s32.totalorder %s25_s26, %s25_s26 }
  0x2c   :  { %p1604_p5 = scmp.ne.s32.totalorder %s25_s26, %s1603_s25  ;;  %p1609_p7 = scmp.lt.s32.totalorder %s1603_s25, %s1603_s25 }
  0x2e   :  { %p1610_p8 = por %p1609_p7, %p1608_p6 }
  0x30   :  { %p1611_p9 = pnand %p1610_p8, %p1604_p5 }
  0x32   :  { %1614 = shalt.err (!%p1611_p9)
}
  0x33   :  { %27 = dma.hbm_to_vmem [thread:$0]  %s1875_s0, 512, %s25_s26, [#allocation3]  }
  0x34   :  { %s1694_s27 = smov [#allocation7]   ;;  %s1695_s29 = smov [#allocation10]  }
  0x35   :  { %s47_s28 = sshll.u32 %s1694_s27, 4  ;;  %s75_s30 = sshll.u32 %s1695_s29, 4  ;;  %s48_s28 = int_to_ptr.vmem [resolvable:$true] %s47_s28  ;;  %s76_s30 = int_to_ptr.vmem [resolvable:$true] %s75_s30 }
  0x36   :  { %s1615_s13 = scalar_lea.hbm %s1878_s3, 1024 }
  0x37   :  { %p1616_p10 = scmp.ne.s32.totalorder %s1878_s3, %s1615_s13  ;;  %p1619_p11 = scmp.lt.u32.totalorder %s1615_s13, %s1878_s3 }
  0x39   :  { %p1621_p12 = pnand %p1619_p11, %p1616_p10 }
  0x3b   :  { %1624 = shalt.err (!%p1621_p12)
}
  0x3c   :  { %s1625_s0 = scalar_lea.vmem %s48_s28, 1024  ;;  %p1630_p0 = scmp.lt.s32.totalorder %s48_s28, %s48_s28 }
  0x3d   :  { %p1626_p13 = scmp.ne.s32.totalorder %s48_s28, %s1625_s0  ;;  %p1631_p1 = scmp.lt.s32.totalorder %s1625_s0, %s1625_s0 }
  0x3f   :  { %p1632_p2 = por %p1631_p1, %p1630_p0 }
  0x41   :  { %p1633_p3 = pnand %p1632_p2, %p1626_p13 }
  0x43   :  { %1636 = shalt.err (!%p1633_p3)
}
  0x44   :  { %53 = dma.hbm_to_vmem [thread:$0]  %s1878_s3, 1024, %s48_s28, [#allocation6], %s1690_s19, %s1690_s19, %s1691_s20  }
  0x45   :  { %s1637_s21 = scalar_lea.hbm %s1882_s7, 1024 }
  0x46   :  { %p1638_p4 = scmp.ne.s32.totalorder %s1882_s7, %s1637_s21  ;;  %p1641_p5 = scmp.lt.u32.totalorder %s1637_s21, %s1882_s7 }
  0x48   :  { %p1643_p6 = pnand %p1641_p5, %p1638_p4 }
  0x4a   :  { %1646 = shalt.err (!%p1643_p6)
}
  0x4b   :  { %s1647_s24 = scalar_lea.vmem %s76_s30, 1024  ;;  %p1652_p8 = scmp.lt.s32.totalorder %s76_s30, %s76_s30 }
  0x4c   :  { %p1648_p7 = scmp.ne.s32.totalorder %s76_s30, %s1647_s24  ;;  %p1653_p9 = scmp.lt.s32.totalorder %s1647_s24, %s1647_s24 }
  0x4e   :  { %p1654_p10 = por %p1653_p9, %p1652_p8 }
  0x50   :  { %p1655_p11 = pnand %p1654_p10, %p1648_p7 }
  0x52   :  { %1658 = shalt.err (!%p1655_p11)
}
  0x53   :  { %81 = dma.hbm_to_vmem [thread:$0]  %s1882_s7, 1024, %s76_s30, [#allocation9], %s1690_s19, %s1690_s19, %s1691_s20  }
  0x54   :  { %1681 = dma.done.wait [#allocation3], 512  }
  0x55   :  { %1682 = vsyncadd [#allocation3], 4294966784 }
  0x56   :  { %1683 = dma.done.wait [#allocation6], 9216  }
  0x57   :  { %1684 = vsyncadd [#allocation6], 4294958080 }
  0x58   :  { %1685 = dma.done.wait [#allocation9], 2048  }
  0x59   :  { %1686 = vsyncadd [#allocation9], 4294965248  ;;  %v1453_v0 = vld [vmem:[#allocation5 + $0x40] sm:$0xff]   ;;  %v1457_v4 = vld [vmem:[#allocation5 + $0x48] sm:$0xff]   ;;  %vm1697_vm0 = vmmov 0   ;;  %s1698_s11 = smov [#allocation11]  }
  0x5a   :  { %v1454_v1 = vld [vmem:[#allocation5 + $0xc0] sm:$0xff]   ;;  %1268 = vmatprep.subr.bf16.mxu0 %v1453_v0  ;;  %v1458_v5 = vld [vmem:[#allocation5 + $0xc8] sm:$0xff]   ;;  %v1461_v8 = vld [vmem:[#allocation5 + $0x50] sm:$0xff]   ;;  %s1157_s12 = sshll.u32 %s1698_s11, 4  ;;  %s1158_s12 = int_to_ptr.vmem [resolvable:$true] %s1157_s12 }
  0x5b   :  { %v1455_v2 = vld [vmem:[#allocation5] sm:$0xff]   ;;  %1290 = vmatprep.subr.bf16.mxu1 %v1454_v1  ;;  %v1459_v6 = vld [vmem:[#allocation5 + $0x8] sm:$0xff]   ;;  %v1462_v9 = vld [vmem:[#allocation5 + $0xd0] sm:$0xff]   ;;  %p1664_p13 = scmp.lt.s32.totalorder %s1158_s12, %s1158_s12 }
  0x5c   :  { %v1456_v3 = vld [vmem:[#allocation5 + $0x80] sm:$0xff]   ;;  %1269 = vmatpush3.bf16.msra.mxu0 %v1455_v2  ;;  %v1460_v7 = vld [vmem:[#allocation5 + $0x88] sm:$0xff]   ;;  %v1463_v10 = vld [vmem:[#allocation5 + $0x10] sm:$0xff]  }
  0x5d   :  { %1291 = vmatpush3.bf16.msra.mxu1 %v1456_v3  ;;  %1270 = vmatprep.subr.bf16.mxu0 %v1457_v4  ;;  %v1464_v11 = vld [vmem:[#allocation5 + $0x90] sm:$0xff]   ;;  %v1465_v12 = vld [vmem:[#allocation5 + $0x58] sm:$0xff]   ;;  %v1469_v16 = vld [vmem:[#allocation5 + $0x60] sm:$0xff]  }
  0x5e   :  { %1292 = vmatprep.subr.bf16.mxu1 %v1458_v5  ;;  %v1466_v13 = vld [vmem:[#allocation5 + $0xd8] sm:$0xff]   ;;  %v1470_v17 = vld [vmem:[#allocation5 + $0xe0] sm:$0xff]   ;;  %v1473_v20 = vld [vmem:[#allocation5 + $0x68] sm:$0xff]  }
  0x5f   :  { %v1467_v14 = vld [vmem:[#allocation5 + $0x18] sm:$0xff]   ;;  %v1471_v18 = vld [vmem:[#allocation5 + $0x20] sm:$0xff]   ;;  %v1474_v21 = vld [vmem:[#allocation5 + $0xe8] sm:$0xff]  }
  0x60   :  { %1271 = vmatpush3.bf16.msra.mxu0 %v1459_v6  ;;  %v1468_v15 = vld [vmem:[#allocation5 + $0x98] sm:$0xff]   ;;  %v1472_v19 = vld [vmem:[#allocation5 + $0xa0] sm:$0xff]   ;;  %v1475_v22 = vld [vmem:[#allocation5 + $0x28] sm:$0xff]  }
  0x61   :  { %1293 = vmatpush3.bf16.msra.mxu1 %v1460_v7  ;;  %1272 = vmatprep.subr.bf16.mxu0 %v1461_v8  ;;  %v1476_v23 = vld [vmem:[#allocation5 + $0xa8] sm:$0xff]   ;;  %v1477_v24 = vld [vmem:[#allocation5 + $0x70] sm:$0xff]   ;;  %v1481_v28 = vld [vmem:[#allocation5 + $0x78] sm:$0xff]  }
  0x62   :  { %1294 = vmatprep.subr.bf16.mxu1 %v1462_v9  ;;  %v1478_v25 = vld [vmem:[#allocation5 + $0xf0] sm:$0xff]   ;;  %v1482_v29 = vld [vmem:[#allocation5 + $0xf8] sm:$0xff]   ;;  %v100_v32 = vld [vmem:[#allocation2] sm:$0xff] }
  0x63   :  { %v1479_v26 = vld [vmem:[#allocation5 + $0x30] sm:$0xff]   ;;  %v1483_v30 = vld [vmem:[#allocation5 + $0x38] sm:$0xff]   ;;  %v101_v33 = vld [vmem:[#allocation2 + $0x8] sm:$0xff]  ;;  %v1169_v34 = vcombine.low %v100_v32, %v100_v32  ;;  %v1170_v35 = vcombine.high %v100_v32, %v100_v32 }
  0x64   :  { %1273 = vmatpush3.bf16.msra.mxu0 %v1463_v10  ;;  %v1480_v27 = vld [vmem:[#allocation5 + $0xb0] sm:$0xff]   ;;  %v1484_v31 = vld [vmem:[#allocation5 + $0xb8] sm:$0xff]   ;;  %v1171_v36 = vcombine.low %v101_v33, %v101_v33  ;;  %v1172_v37 = vcombine.high %v101_v33, %v101_v33  ;;  %v1489_v38 = vld [vmem:[#allocation5 + $0x140] sm:$0xff]  }
  0x65   :  { %1295 = vmatpush3.bf16.msra.mxu1 %v1464_v11  ;;  %1274 = vmatprep.subr.bf16.mxu0 %v1465_v12  ;;  %v1490_v39 = vld [vmem:[#allocation5 + $0x1c0] sm:$0xff]   ;;  %v1493_v42 = vld [vmem:[#allocation5 + $0x148] sm:$0xff]   ;;  %v1497_v46 = vld [vmem:[#allocation5 + $0x150] sm:$0xff]  }
  0x66   :  { %1296 = vmatprep.subr.bf16.mxu1 %v1466_v13  ;;  %683 = vmatprep.mubr.bf16.mxu0 %v1170_v35  ;;  %v1491_v40 = vld [vmem:[#allocation5 + $0x100] sm:$0xff]   ;;  %v1494_v43 = vld [vmem:[#allocation5 + $0x1c8] sm:$0xff]   ;;  %v1498_v47 = vld [vmem:[#allocation5 + $0x1d0] sm:$0xff]   ;;  %v1696_v13 = vmov 0.0  }
  0x67   :  { %723 = vmatprep.mubr.bf16.mxu1 %v1172_v37  ;;  %v1492_v41 = vld [vmem:[#allocation5 + $0x180] sm:$0xff]   ;;  %v1495_v44 = vld [vmem:[#allocation5 + $0x108] sm:$0xff]   ;;  %v1499_v48 = vld [vmem:[#allocation5 + $0x110] sm:$0xff]  }
  0x68   :  { %1275 = vmatpush3.bf16.msra.mxu0 %v1467_v14  ;;  %v1496_v45 = vld [vmem:[#allocation5 + $0x188] sm:$0xff]   ;;  %v1500_v49 = vld [vmem:[#allocation5 + $0x190] sm:$0xff]   ;;  %v1501_v50 = vld [vmem:[#allocation5 + $0x158] sm:$0xff]  }
  0x69   :  { %1297 = vmatpush3.bf16.msra.mxu1 %v1468_v15  ;;  %1276 = vmatprep.subr.bf16.mxu0 %v1469_v16  ;;  %v1502_v51 = vld [vmem:[#allocation5 + $0x1d8] sm:$0xff]   ;;  %v1505_v54 = vld [vmem:[#allocation5 + $0x160] sm:$0xff]   ;;  %v1509_v58 = vld [vmem:[#allocation5 + $0x168] sm:$0xff]  }
  0x6a   :  { %1298 = vmatprep.subr.bf16.mxu1 %v1470_v17  ;;  %v1503_v52 = vld [vmem:[#allocation5 + $0x118] sm:$0xff]   ;;  %v1506_v55 = vld [vmem:[#allocation5 + $0x1e0] sm:$0xff]   ;;  %v1510_v59 = vld [vmem:[#allocation5 + $0x1e8] sm:$0xff]  }
  0x6b   :  { %v1504_v53 = vld [vmem:[#allocation5 + $0x198] sm:$0xff]   ;;  %v1507_v56 = vld [vmem:[#allocation5 + $0x120] sm:$0xff]   ;;  %v1511_v60 = vld [vmem:[#allocation5 + $0x128] sm:$0xff]  }
  0x6c   :  { %1277 = vmatpush3.bf16.msra.mxu0 %v1471_v18  ;;  %v1508_v57 = vld [vmem:[#allocation5 + $0x1a0] sm:$0xff]   ;;  %v1512_v61 = vld [vmem:[#allocation5 + $0x1a8] sm:$0xff]   ;;  %v1513_v62 = vld [vmem:[#allocation5 + $0x170] sm:$0xff]  }
  0x6d   :  { %1299 = vmatpush3.bf16.msra.mxu1 %v1472_v19  ;;  %1278 = vmatprep.subr.bf16.mxu0 %v1473_v20  ;;  %v1514_v63 = vld [vmem:[#allocation5 + $0x1f0] sm:$0xff]   ;;  %v1517_v2 = vld [vmem:[#allocation5 + $0x178] sm:$0xff]   ;;  %v1525_v12 = vld [vmem:[#allocation7] sm:$0xff]  }
  0x6e   :  { %1300 = vmatprep.subr.bf16.mxu1 %v1474_v21  ;;  %v1515_v0 = vld [vmem:[#allocation5 + $0x130] sm:$0xff]   ;;  %v1518_v3 = vld [vmem:[#allocation5 + $0x1f8] sm:$0xff]   ;;  %v1526_v14 = vld [vmem:[#allocation7 + $0x8] sm:$0xff]  }
  0x6f   :  { %v1516_v1 = vld [vmem:[#allocation5 + $0x1b0] sm:$0xff]   ;;  %v1519_v4 = vld [vmem:[#allocation5 + $0x138] sm:$0xff]   ;;  %v1529_v17 = vld [vmem:[#allocation7 + $0x20] sm:$0xff]  }
  0x70   :  { %1279 = vmatpush3.bf16.msra.mxu0 %v1475_v22  ;;  %v1520_v5 = vld [vmem:[#allocation5 + $0x1b8] sm:$0xff]   ;;  %v102_v6 = vld [vmem:[#allocation2 + $0x10] sm:$0xff]  ;;  %v1530_v18 = vld [vmem:[#allocation7 + $0x28] sm:$0xff]  }
  0x71   :  { %1301 = vmatpush3.bf16.msra.mxu1 %v1476_v23  ;;  %1280 = vmatprep.subr.bf16.mxu0 %v1477_v24  ;;  %v1173_v7 = vcombine.low %v102_v6, %v102_v6  ;;  %v1174_v8 = vcombine.high %v102_v6, %v102_v6  ;;  %v103_v9 = vld [vmem:[#allocation2 + $0x18] sm:$0xff]  ;;  %v1527_v15 = vld [vmem:[#allocation7 + $0x10] sm:$0xff]   ;;  %v1533_v21 = vld [vmem:[#allocation8] sm:$0xff]  }
  0x72   :  { %1302 = vmatprep.subr.bf16.mxu1 %v1478_v25  ;;  %v1175_v10 = vcombine.low %v103_v9, %v103_v9  ;;  %v1176_v11 = vcombine.high %v103_v9, %v103_v9  ;;  %v1528_v16 = vld [vmem:[#allocation7 + $0x18] sm:$0xff]   ;;  %v1531_v19 = vld [vmem:[#allocation7 + $0x30] sm:$0xff]   ;;  %v1534_v22 = vld [vmem:[#allocation8 + $0x8] sm:$0xff]  }
  0x73   :  { %v1532_v20 = vld [vmem:[#allocation7 + $0x38] sm:$0xff]   ;;  %v1535_v23 = vld [vmem:[#allocation8 + $0x10] sm:$0xff]   ;;  %v1537_v25 = vld [vmem:[#allocation8 + $0x20] sm:$0xff]  }
  0x74   :  { %1281 = vmatpush3.bf16.msra.mxu0 %v1479_v26  ;;  %v1536_v24 = vld [vmem:[#allocation8 + $0x18] sm:$0xff]   ;;  %v1538_v26 = vld [vmem:[#allocation8 + $0x28] sm:$0xff]   ;;  %v1547_v6 = vld [vmem:[#allocation10 + $0x30] sm:$0xff]  }
  0x75   :  { %1303 = vmatpush3.bf16.msra.mxu1 %v1480_v27  ;;  %1282 = vmatprep.subr.bf16.mxu0 %v1481_v28 }
  0x76   :  { %1304 = vmatprep.subr.bf16.mxu1 %v1482_v29  ;;  %v1168_v29 = vld [vmem:[%s1877_s2] ss:$0 sm:$0xff] }
  0x78   :  { %1283 = vmatpush3.bf16.msra.mxu0 %v1483_v30 }
  0x79   :  { %1305 = vmatpush3.bf16.msra.mxu1 %v1484_v31  ;;  %1312 = vmatprep.subr.bf16.mxu0 %v1489_v38 }
  0x7a   :  { %1334 = vmatprep.subr.bf16.mxu1 %v1490_v39 }
  0x7b   :  { %684 = vmatmul.mubr.bf16.vlgmr.msra.gmra.mrb[0].mxu0 %v1169_v34 }
  0x7c   :  { %724 = vmatmul.mubr.bf16.vlgmr.msra.gmra.mrb[0].mxu1 %v1171_v36  ;;  %1313 = vmatpush3.bf16.msra.mxu0 %v1491_v40 }
  0x7d   :  { %1335 = vmatpush3.bf16.msra.mxu1 %v1492_v41  ;;  %1314 = vmatprep.subr.bf16.mxu0 %v1493_v42 }
  0x7e   :  { %1336 = vmatprep.subr.bf16.mxu1 %v1494_v43  ;;  %763 = vmatprep.mubr.bf16.mxu0 %v1174_v8  ;;  %v1250_v8 = vld [vmem:[%s1881_s6] ss:$0 sm:$0xff]  ;;  %s1659_s6 = scalar_lea.vmem %s1158_s12, 128 }
  0x7f   :  { %803 = vmatprep.mubr.bf16.mxu1 %v1176_v11  ;;  %p1660_p12 = scmp.ne.s32.totalorder %s1158_s12, %s1659_s6  ;;  %p1665_p0 = scmp.lt.s32.totalorder %s1659_s6, %s1659_s6 }
  0x80   :  { %1315 = vmatpush3.bf16.msra.mxu0 %v1495_v44 }
  0x81   :  { %1337 = vmatpush3.bf16.msra.mxu1 %v1496_v45  ;;  %1316 = vmatprep.subr.bf16.mxu0 %v1497_v46  ;;  %p1666_p1 = por %p1665_p0, %p1664_p13 }
  0x82   :  { %1338 = vmatprep.subr.bf16.mxu1 %v1498_v47 }
  0x83   :  { %p1667_p2 = pnand %p1666_p1, %p1660_p12 }
  0x84   :  { %1317 = vmatpush3.bf16.msra.mxu0 %v1499_v48 }
  0x85   :  { %1339 = vmatpush3.bf16.msra.mxu1 %v1500_v49  ;;  %1318 = vmatprep.subr.bf16.mxu0 %v1501_v50 }
  0x86   :  { %1340 = vmatprep.subr.bf16.mxu1 %v1502_v51 }
  0x88   :  { %1319 = vmatpush3.bf16.msra.mxu0 %v1503_v52 }
  0x89   :  { %1341 = vmatpush3.bf16.msra.mxu1 %v1504_v53  ;;  %1320 = vmatprep.subr.bf16.mxu0 %v1505_v54  ;;  %v1539_v54 = vld [vmem:[#allocation8 + $0x30] sm:$0xff]  }
  0x8a   :  { %1342 = vmatprep.subr.bf16.mxu1 %v1506_v55  ;;  %v1540_v55 = vld [vmem:[#allocation8 + $0x38] sm:$0xff]  }
  0x8c   :  { %1321 = vmatpush3.bf16.msra.mxu0 %v1507_v56  ;;  %v1541_v56 = vld [vmem:[#allocation10] sm:$0xff]  }
  0x8d   :  { %1343 = vmatpush3.bf16.msra.mxu1 %v1508_v57  ;;  %1322 = vmatprep.subr.bf16.mxu0 %v1509_v58  ;;  %v1542_v57 = vld [vmem:[#allocation10 + $0x8] sm:$0xff]   ;;  %v1543_v58 = vld [vmem:[#allocation10 + $0x10] sm:$0xff]  }
  0x8e   :  { %1344 = vmatprep.subr.bf16.mxu1 %v1510_v59  ;;  %v1544_v59 = vld [vmem:[#allocation10 + $0x18] sm:$0xff]  }
  0x90   :  { %1323 = vmatpush3.bf16.msra.mxu0 %v1511_v60  ;;  %v1545_v60 = vld [vmem:[#allocation10 + $0x20] sm:$0xff]  }
  0x91   :  { %1345 = vmatpush3.bf16.msra.mxu1 %v1512_v61  ;;  %1324 = vmatprep.subr.bf16.mxu0 %v1513_v62  ;;  %v1546_v61 = vld [vmem:[#allocation10 + $0x28] sm:$0xff]   ;;  %v1241_v62 = vld [vmem:[%s1879_s4] ss:$0 sm:$0xff] }
  0x92   :  { %1346 = vmatprep.subr.bf16.mxu1 %v1514_v63 }
  0x94   :  { %1325 = vmatpush3.bf16.msra.mxu0 %v1515_v0 }
  0x95   :  { %1347 = vmatpush3.bf16.msra.mxu1 %v1516_v1  ;;  %1326 = vmatprep.subr.bf16.mxu0 %v1517_v2 }
  0x96   :  { %1348 = vmatprep.subr.bf16.mxu1 %v1518_v3 }
  0x98   :  { %1327 = vmatpush3.bf16.msra.mxu0 %v1519_v4 }
  0x99   :  { %1349 = vmatpush3.bf16.msra.mxu1 %v1520_v5  ;;  %1383 = vmatprep.subr.bf16.mxu0 %v1696_v13 }
  0x9a   :  { %1403 = vmatprep.subr.bf16.mxu1 %v1696_v13 }
  0x9b   :  { %764 = vmatmul.mubr.bf16.vlgmr.msra.gmra.mrb[4].mxu0 %v1173_v7  ;;  %v1548_v7 = vld [vmem:[#allocation10 + $0x38] sm:$0xff]  }
  0x9c   :  { %804 = vmatmul.mubr.bf16.vlgmr.msra.gmra.mrb[4].mxu1 %v1175_v10  ;;  %1384 = vmatpush3.bf16.msra.mxu0 %v1525_v12 }
  0x9d   :  { %1385 = vmatprep.subr.bf16.mxu0 %v1696_v13  ;;  %1399 = vmatprep.mubr.msk.bf16.mxu0 %vm1697_vm0, %v1696_v13 }
  0x9e   :  { %1419 = vmatprep.mubr.msk.bf16.mxu1 %vm1697_vm0, %v1696_v13  ;;  %1404 = vmatpush3.bf16.msra.mxu1 %v1533_v21 }
  0x9f   :  { %1405 = vmatprep.subr.bf16.mxu1 %v1696_v13 }
  0xa0   :  { %1386 = vmatpush3.bf16.msra.mxu0 %v1526_v14 }
  0xa1   :  { %1387 = vmatprep.subr.bf16.mxu0 %v1696_v13 }
  0xa2   :  { %1406 = vmatpush3.bf16.msra.mxu1 %v1534_v22 }
  0xa3   :  { %1407 = vmatprep.subr.bf16.mxu1 %v1696_v13 }
  0xa4   :  { %1388 = vmatpush3.bf16.msra.mxu0 %v1527_v15 }
  0xa5   :  { %1389 = vmatprep.subr.bf16.mxu0 %v1696_v13 }
  0xa6   :  { %1408 = vmatpush3.bf16.msra.mxu1 %v1535_v23 }
  0xa7   :  { %1409 = vmatprep.subr.bf16.mxu1 %v1696_v13 }
  0xa8   :  { %1390 = vmatpush3.bf16.msra.mxu0 %v1528_v16 }
  0xa9   :  { %1391 = vmatprep.subr.bf16.mxu0 %v1696_v13 }
  0xaa   :  { %1410 = vmatpush3.bf16.msra.mxu1 %v1536_v24 }
  0xab   :  { %1411 = vmatprep.subr.bf16.mxu1 %v1696_v13 }
  0xac   :  { %1392 = vmatpush3.bf16.msra.mxu0 %v1529_v17  ;;  %v1259_v17 = vld [vmem:[%s1883_s8] ss:$0 sm:$0xff] }
  0xad   :  { %1393 = vmatprep.subr.bf16.mxu0 %v1696_v13 }
  0xae   :  { %1412 = vmatpush3.bf16.msra.mxu1 %v1537_v25 }
  0xaf   :  { %1413 = vmatprep.subr.bf16.mxu1 %v1696_v13 }
  0xb0   :  { %1394 = vmatpush3.bf16.msra.mxu0 %v1530_v18 }
  0xb1   :  { %1395 = vmatprep.subr.bf16.mxu0 %v1696_v13 }
  0xb2   :  { %1414 = vmatpush3.bf16.msra.mxu1 %v1538_v26 }
  0xb3   :  { %1415 = vmatprep.subr.bf16.mxu1 %v1696_v13 }
  0xb4   :  { %1396 = vmatpush3.bf16.msra.mxu0 %v1531_v19 }
  0xb5   :  { %1397 = vmatprep.subr.bf16.mxu0 %v1696_v13 }
  0xb6   :  { %1416 = vmatpush3.bf16.msra.mxu1 %v1539_v54 }
  0xb7   :  { %1417 = vmatprep.subr.bf16.mxu1 %v1696_v13 }
  0xb8   :  { %1398 = vmatpush3.bf16.msra.mxu0 %v1532_v20 }
  0xb9   :  { %1423 = vmatprep.subr.bf16.mxu0 %v1696_v13 }
  0xba   :  { %1418 = vmatpush3.bf16.msra.mxu1 %v1540_v55 }
 0x14e   :  { %v1284_v27 = vpop.f32.mrb[0].mxu0 }
 0x14f   :  { %v1306_v28 = vpop.f32.mrb[0].mxu1  ;;  %v1285_v30 = vpop.f32.mrb[1].mxu0 }
 0x150   :  { %v1307_v31 = vpop.f32.mrb[1].mxu1  ;;  %v1286_v32 = vadd.f32 %v1285_v30, %v1284_v27  ;;  %v1287_v34 = vpop.f32.mrb[2].mxu0 }
 0x151   :  { %v1308_v33 = vadd.f32 %v1307_v31, %v1306_v28  ;;  %v1309_v35 = vpop.f32.mrb[2].mxu1  ;;  %v1288_v36 = vpop.f32.mrb[3].mxu0 }
 0x152   :  { %v1310_v37 = vpop.f32.mrb[3].mxu1  ;;  %v686_v38 = vadd.f32 %v1286_v32, %v1168_v29 }
 0x154   :  { %v726_v39 = vadd.f32 %v1308_v33, %v686_v38 }
 0x16e   :  { %v1328_v40 = vpop.f32.mrb[4].mxu0 }
 0x16f   :  { %v1350_v41 = vpop.f32.mrb[4].mxu1  ;;  %v1329_v42 = vpop.f32.mrb[5].mxu0 }
 0x170   :  { %v1351_v43 = vpop.f32.mrb[5].mxu1  ;;  %v1330_v44 = vadd.f32 %v1329_v42, %v1328_v40  ;;  %v1331_v46 = vpop.f32.mrb[6].mxu0 }
 0x171   :  { %v1352_v45 = vadd.f32 %v1351_v43, %v1350_v41  ;;  %v1353_v47 = vpop.f32.mrb[6].mxu1  ;;  %v1332_v48 = vpop.f32.mrb[7].mxu0 }
 0x172   :  { %v1354_v49 = vpop.f32.mrb[7].mxu1  ;;  %v766_v50 = vadd.f32 %v1330_v44, %v726_v39 }
 0x174   :  { %v806_v51 = vadd.f32 %v1352_v45, %v766_v50 }
 0x176   :  { %v811_v52 = vmax.f32 %v806_v51, 0.0 }
 0x178   :  { %v812_v53 = vpack.c.bf16 %v811_v52, %v811_v52 }
 0x17a   :  { %1400 = vmatmul.mubr.bf16.vlgmr.msra.gmra.mrb[8].mxu0 %v812_v53 }
 0x17b   :  { %1439 = vmatprep.mubr.msk.bf16.mxu0 %vm1697_vm0, %v1696_v13  ;;  %1424 = vmatpush3.bf16.msra.mxu0 %v1541_v56 }
 0x17c   :  { %1425 = vmatprep.subr.bf16.mxu0 %v1696_v13 }
 0x17f   :  { %1426 = vmatpush3.bf16.msra.mxu0 %v1542_v57 }
 0x180   :  { %1427 = vmatprep.subr.bf16.mxu0 %v1696_v13 }
 0x183   :  { %1428 = vmatpush3.bf16.msra.mxu0 %v1543_v58 }
 0x184   :  { %1429 = vmatprep.subr.bf16.mxu0 %v1696_v13 }
 0x187   :  { %1430 = vmatpush3.bf16.msra.mxu0 %v1544_v59 }
 0x188   :  { %1431 = vmatprep.subr.bf16.mxu0 %v1696_v13 }
 0x18b   :  { %1432 = vmatpush3.bf16.msra.mxu0 %v1545_v60 }
 0x18c   :  { %1433 = vmatprep.subr.bf16.mxu0 %v1696_v13 }
 0x18f   :  { %1434 = vmatpush3.bf16.msra.mxu0 %v1546_v61 }
 0x190   :  { %1435 = vmatprep.subr.bf16.mxu0 %v1696_v13 }
 0x193   :  { %1436 = vmatpush3.bf16.msra.mxu0 %v1547_v6 }
 0x194   :  { %1437 = vmatprep.subr.bf16.mxu0 %v1696_v13 }
 0x197   :  { %1438 = vmatpush3.bf16.msra.mxu0 %v1548_v7 }
 0x24d   :  { %v918_v63 = vpop.f32.mrb[8].mxu0 }
 0x24e   :  { %v919_v0 = vadd.f32 %v1241_v62, %v918_v63  ;;  %v1401_v1 = vpop.f32.mrb[9].mxu0 }
 0x24f   :  { %v921_v2 = vpop.f32.mrb[10].mxu0 }
 0x250   :  { %v924_v3 = vmax.f32 %v919_v0, 0.0  ;;  %v1402_v4 = vpop.f32.mrb[11].mxu0 }
 0x252   :  { %v925_v5 = vpack.c.bf16 %v924_v3, %v924_v3 }
 0x254   :  { %1420 = vmatmul.mubr.bf16.vlgmr.msra.gmra.mrb[8].mxu1 %v925_v5 }
 0x327   :  { %v1031_v9 = vpop.f32.mrb[8].mxu1 }
 0x328   :  { %v1032_v10 = vadd.f32 %v1250_v8, %v1031_v9  ;;  %v1421_v11 = vpop.f32.mrb[9].mxu1 }
 0x329   :  { %v1034_v12 = vpop.f32.mrb[10].mxu1 }
 0x32a   :  { %v1037_v14 = vmax.f32 %v1032_v10, 0.0  ;;  %v1422_v15 = vpop.f32.mrb[11].mxu1 }
 0x32c   :  { %v1038_v16 = vpack.c.bf16 %v1037_v14, %v1037_v14 }
 0x32e   :  { %1440 = vmatmul.mubr.bf16.vlgmr.msra.gmra.mrb[12].mxu0 %v1038_v16 }
 0x401   :  { %v1144_v13 = vpop.f32.mrb[12].mxu0 }
 0x402   :  { %v1145_v18 = vadd.f32 %v1259_v17, %v1144_v13  ;;  %v1441_v19 = vpop.f32.mrb[13].mxu0 }
 0x403   :  { %v1147_v20 = vpop.f32.mrb[14].mxu0 }
 0x404   :  { %1150 = vst [vmem:[#allocation11] sm:$0xff] %v1145_v18  ;;  %v1442_v21 = vpop.f32.mrb[15].mxu0 }
 0x405   :  { %1670 = shalt.err (!%p1667_p2)
}
 0x406   :  { %s1671_s8 = scalar_lea.hbm %s1884_s9, 128 }
 0x407   :  { %p1672_p3 = scmp.ne.s32.totalorder %s1884_s9, %s1671_s8  ;;  %p1675_p4 = scmp.lt.u32.totalorder %s1671_s8, %s1884_s9 }
 0x409   :  { %p1677_p5 = pnand %p1675_p4, %p1672_p3 }
 0x40b   :  { %1680 = shalt.err (!%p1677_p5)
}
 0x40c   :  { %1160 = dma.vmem_to_hbm [thread:$0]  %s1158_s12, 128, %s1884_s9, [#allocation4]  }
 0x40d   :  { %1687 = dma.done.wait [#allocation4], 128  }
 0x40e   :  { %1688 = vsyncadd [#allocation4], 4294967168 }
 0x40f   :  { %1164 = vsyncpa [#allocation3], 1 }
 0x410   :  { %1165 = vsyncpa [#allocation6], 1 }
 0x411   :  { %1166 = vsyncpa [#allocation9], 1 }
 0x412   :  { %1167 = vsyncpa [#allocation4], 1 }

</bundles_post_ra>
